<compile_context>
chip_gen: v7x
topology: tpu7x:2x2x1
jax: 0.10.0
libtpu: 0.0.40
codegen_flags: <defaults>
</compile_context>

<pallas_src>
import functools

import jax
import jax.numpy as jnp
from jax import lax
from jax.experimental import pallas as pl
from jax.experimental.pallas import tpu as pltpu

LANES = 128  # TPU lane width


# ------------------------------- Pallas kernel ------------------------------- #

def _naf_kernel(x_ref, act_ref, eps_ref,
                w1_ref, b1_ref, w2_ref, b2_ref, wh_ref, bh_ref,
                out_ref, *, A):
    x = x_ref[...]

    h1 = jnp.dot(x, w1_ref[...], preferred_element_type=jnp.float32) + b1_ref[...]
    h1 = jnp.maximum(h1, 0.0)

    h2 = jnp.dot(h1, w2_ref[...], preferred_element_type=jnp.float32) + b2_ref[...]
    h2 = jnp.maximum(h2, 0.0)

    # Fused heads: one MXU push producing (TB, 256).
    head = jnp.dot(h2, wh_ref[...], preferred_element_type=jnp.float32) + bh_ref[...]

    # tanh everything except the V lane (global lane index A).  Padded lanes are
    # exactly zero (zero weights / biases) so tanh(0) = 0 keeps them zero.
    lane2 = lax.broadcasted_iota(jnp.int32, head.shape, 1)
    head = jnp.where(lane2 == A, head, jnp.tanh(head))

    mu_slab = head[:, :LANES]   # lanes [0, A) = mu, lane A = V (128-aligned slice)
    d_slab = head[:, LANES:]    # lanes [0, A) = d

    lane = lax.broadcasted_iota(jnp.int32, mu_slab.shape, 1)
    a_mask = lane < A

    # V as a per-row scalar (masked lane reduction, XLU).
    V = jnp.sum(jnp.where(lane == A, mu_slab, 0.0), axis=-1, keepdims=True)

    # P = L * L^T (elementwise!) is diagonal with P_ii = exp(2 d_i).
    diff = act_ref[...] - mu_slab
    quad = jnp.sum(jnp.where(a_mask, jnp.exp(2.0 * d_slab) * diff * diff, 0.0),
                   axis=-1, keepdims=True)
    Q = -0.5 * quad + V

    # MultivariateNormal(mu, inv(P)) sample: per-dim std = exp(-d_i).
    sampled = jnp.clip(mu_slab + jnp.exp(-d_slab) * eps_ref[...], -1.0, 1.0)

    # One lane-dense (TB, 128) write: [sampled(A) | Q | V | zeros].
    out_ref[...] = (jnp.where(a_mask, sampled, 0.0)
                    + jnp.where(lane == A, Q, 0.0)
                    + jnp.where(lane == A + 1, V, 0.0))


# ------------------------------ pallas_call wrap ------------------------------ #

def _round_up(n, m):
    return (n + m - 1) // m * m


def naf_pallas(x, action, eps, packed, *, A, batch_tile=None):
    """Runs the fully fused NAF forward on TPU. Returns (sampled, Q, V)."""
    B, S = x.shape
    H = packed["w1"].shape[1]
    assert A + 2 <= LANES

    if batch_tile is None:
        batch_tile = min(512, _round_up(B, 8))     # small per-tile VMEM, v7x-safe
    TB = batch_tile
    B_pad = _round_up(max(B, TB), TB)

    xp = jnp.zeros((B_pad, S), jnp.float32).at[:B].set(x)
    ap = jnp.zeros((B_pad, LANES), jnp.float32).at[:B, :A].set(action)
    ep = jnp.zeros((B_pad, LANES), jnp.float32).at[:B, :A].set(eps)

    grid = (B_pad // TB,)

    def rowmap(i):
        return (i, 0)

    def fixed(i):
        return (0, 0)

    flops = 2 * B_pad * (S * H + H * H + H * 2 * LANES)
    transcendentals = B_pad * 4 * LANES            # tanh + two exp, rough
    bytes_accessed = 4 * (xp.size + ap.size + ep.size
                          + sum(int(v.size) for v in packed.values())
                          + B_pad * LANES)

    out = pl.pallas_call(
        functools.partial(_naf_kernel, A=A),
        grid=grid,
        in_specs=[
            pl.BlockSpec((TB, S), rowmap),
            pl.BlockSpec((TB, LANES), rowmap),
            pl.BlockSpec((TB, LANES), rowmap),
            pl.BlockSpec(packed["w1"].shape, fixed),
            pl.BlockSpec(packed["b1"].shape, fixed),
            pl.BlockSpec(packed["w2"].shape, fixed),
            pl.BlockSpec(packed["b2"].shape, fixed),
            pl.BlockSpec(packed["wh"].shape, fixed),
            pl.BlockSpec(packed["bh"].shape, fixed),
        ],
        out_specs=pl.BlockSpec((TB, LANES), rowmap),
        out_shape=jax.ShapeDtypeStruct((B_pad, LANES), jnp.float32),
        compiler_params=pltpu.CompilerParams(
            dimension_semantics=("parallel",)),
        cost_estimate=pl.CostEstimate(flops=flops,
                                      transcendentals=transcendentals,
                                      bytes_accessed=bytes_accessed),
    )(xp, ap, ep,
      packed["w1"], packed["b1"], packed["w2"], packed["b2"],
      packed["wh"], packed["bh"])

    sampled = out[:B, :A]
    Q = out[:B, A:A + 1]
    V = out[:B, A + 1:A + 2]
    return sampled, Q, V


# --------------------------- Parameter packing / init ------------------------- #

def pack_params(params, action_size):
    """Pack the three head layers into one lane-padded [H, 256] weight slab."""
    A = action_size
    H = params["w1t"].shape[1]
    r = jnp.arange(A)
    diag_idx = (r * (r + 3)) // 2      # row-major tril positions of (i, i)

    wh = jnp.zeros((H, 2 * LANES), jnp.float32)
    wh = wh.at[:, :A].set(params["wat"])
    wh = wh.at[:, A].set(params["wvt"][:, 0])
    wh = wh.at[:, LANES:LANES + A].set(params["wet"][:, diag_idx])

    bh = jnp.zeros((1, 2 * LANES), jnp.float32)
    bh = bh.at[:, :A].set(params["ba"])
    bh = bh.at[:, A].set(params["bv"][:, 0])
    bh = bh.at[:, LANES:LANES + A].set(params["be"][:, diag_idx])

    return dict(w1=params["w1t"], b1=params["b1"],
                w2=params["w2t"], b2=params["b2"],
                wh=wh, bh=bh)


def init_params(key, state_size, action_size, layer_size):
    """Deterministic PyTorch-Linear-style init (uniform(-1/sqrt(fan_in), ...))."""
    n_entries = action_size * (action_size + 1) // 2

    def linear(k, fan_in, fan_out):
        kw, kb = jax.random.split(k)
        bound = 1.0 / jnp.sqrt(jnp.float32(fan_in))
        w = jax.random.uniform(kw, (fan_in, fan_out), jnp.float32, -bound, bound)
        b = jax.random.uniform(kb, (1, fan_out), jnp.float32, -bound, bound)
        return w, b

    k1, k2, k3, k4, k5 = jax.random.split(key, 5)
    w1t, b1 = linear(k1, state_size, layer_size)
    w2t, b2 = linear(k2, layer_size, layer_size)
    wat, ba = linear(k3, layer_size, action_size)
    wet, be = linear(k4, layer_size, n_entries)
    wvt, bv = linear(k5, layer_size, 1)
    return dict(w1t=w1t, b1=b1, w2t=w2t, b2=b2,
                wat=wat, ba=ba, wet=wet, be=be, wvt=wvt, bv=bv)


# ------------------------------ Forward (wrapper) ----------------------------- #

def naf_forward(params, input_, action=None, *, sample_key=None):
    """Mirrors NAFNetwork.forward. Returns (sampled_action, Q, V)."""
    B = input_.shape[0]
    A = params["wat"].shape[1]

    packed = pack_params(params, A)

    if sample_key is None:
        sample_key = jax.random.PRNGKey(0)
    # TODO(synk): the N(0, I) draw itself stays in jax.random; the MVN sampling
    # transform (Cholesky of inv(P)) is fused analytically into the kernel.
    eps = jax.random.normal(sample_key, (B, A), dtype=jnp.float32)

    act_in = action if action is not None else jnp.zeros((B, A), jnp.float32)
    sampled, Q, V = naf_pallas(input_.astype(jnp.float32), act_in, eps, packed, A=A)
    if action is None:
        Q = None
    return sampled, Q, V


# --------------------------- Pure-JAX reference check -------------------------- #

def naf_reference(params, input_, action, eps):
    """Literal translation of the PyTorch forward (tril / inv / cholesky path)."""
    A = params["wat"].shape[1]
    B = input_.shape[0]
    hi = lax.Precision.HIGHEST
    h1 = jnp.maximum(jnp.dot(input_, params["w1t"], precision=hi) + params["b1"], 0.0)
    h2 = jnp.maximum(jnp.dot(h1, params["w2t"], precision=hi) + params["b2"], 0.0)
    mu = jnp.tanh(jnp.dot(h2, params["wat"], precision=hi) + params["ba"])
    entries = jnp.tanh(jnp.dot(h2, params["wet"], precision=hi) + params["be"])
    V = jnp.dot(h2, params["wvt"], precision=hi) + params["bv"]

    rows, cols = jnp.tril_indices(A)
    L = jnp.zeros((B, A, A), jnp.float32).at[:, rows, cols].set(entries)
    diag = jnp.arange(A)
    L = L.at[:, diag, diag].set(jnp.exp(L[:, diag, diag]))
    P = L * jnp.transpose(L, (0, 2, 1))             # elementwise, as in reference

    diff = (action - mu)[..., None]
    quad = jnp.matmul(jnp.transpose(diff, (0, 2, 1)), jnp.matmul(P, diff))
    Q = (-0.5 * quad)[..., 0] + V

    cov = jnp.linalg.inv(P)
    chol = jnp.linalg.cholesky(cov)
    sampled = jnp.clip(mu + jnp.einsum("bij,bj->bi", chol, eps), -1.0, 1.0)
    return sampled, Q, V


# ----------------------------------- main ------------------------------------ #

if __name__ == "__main__":
    STATE_SIZE = 8
    ACTION_SIZE = 4
    LAYER_SIZE = 32
    BATCH = 8

    root = jax.random.PRNGKey(0)
    k_params, k_x, k_a, k_sample = jax.random.split(root, 4)

    params = init_params(k_params, STATE_SIZE, ACTION_SIZE, LAYER_SIZE)
    x = jax.random.normal(k_x, (BATCH, STATE_SIZE), dtype=jnp.float32)
    act = jax.random.uniform(k_a, (BATCH, ACTION_SIZE), jnp.float32, -1.0, 1.0)

    sampled_action, Q, V = naf_forward(params, x, action=act, sample_key=k_sample)
    jax.block_until_ready((sampled_action, Q, V))

    assert sampled_action.shape == (BATCH, ACTION_SIZE)
    assert Q.shape == (BATCH, 1)
    assert V.shape == (BATCH, 1)

    # Numeric sanity check against the literal (un-fused) reference path.
    eps = jax.random.normal(k_sample, (BATCH, ACTION_SIZE), dtype=jnp.float32)
    s_ref, q_ref, v_ref = naf_reference(params, x, act, eps)
    assert jnp.allclose(sampled_action, s_ref, rtol=2e-2, atol=2e-2)
    assert jnp.allclose(Q, q_ref, rtol=2e-2, atol=2e-2)
    assert jnp.allclose(V, v_ref, rtol=2e-2, atol=2e-2)

    print("KERNEL_OK")
</pallas_src>

<mosaic_0001>
module attributes {stable_mosaic.version = 11 : i64} {
  func.func @_naf_kernel(%arg0: i32, %arg1: memref<8x8xf32, #tpu.memory_space<vmem>>, %arg2: memref<8x128xf32, #tpu.memory_space<vmem>>, %arg3: memref<8x128xf32, #tpu.memory_space<vmem>>, %arg4: memref<8x32xf32, #tpu.memory_space<vmem>>, %arg5: memref<1x32xf32, #tpu.memory_space<vmem>>, %arg6: memref<32x32xf32, #tpu.memory_space<vmem>>, %arg7: memref<1x32xf32, #tpu.memory_space<vmem>>, %arg8: memref<32x256xf32, #tpu.memory_space<vmem>>, %arg9: memref<1x256xf32, #tpu.memory_space<vmem>>, %arg10: memref<8x128xf32, #tpu.memory_space<vmem>>) attributes {dimension_semantics = [#tpu.dimension_semantics<parallel>], iteration_bounds = array<i64: 1>, scalar_prefetch = 0 : i64, scratch_operands = 0 : i64, tpu.core_type = #tpu.core_type<tc>, window_params = [{transform_indices = @transform_0, window_bounds = array<i64: 8, 8>}, {transform_indices = @transform_1, window_bounds = array<i64: 8, 128>}, {transform_indices = @transform_2, window_bounds = array<i64: 8, 128>}, {pipeline_mode = #tpu.pipeline_mode<synchronous>, transform_indices = @transform_3, window_bounds = array<i64: 8, 32>}, {pipeline_mode = #tpu.pipeline_mode<synchronous>, transform_indices = @transform_4, window_bounds = array<i64: 1, 32>}, {pipeline_mode = #tpu.pipeline_mode<synchronous>, transform_indices = @transform_5, window_bounds = array<i64: 32, 32>}, {pipeline_mode = #tpu.pipeline_mode<synchronous>, transform_indices = @transform_6, window_bounds = array<i64: 1, 32>}, {pipeline_mode = #tpu.pipeline_mode<synchronous>, transform_indices = @transform_7, window_bounds = array<i64: 32, 256>}, {pipeline_mode = #tpu.pipeline_mode<synchronous>, transform_indices = @transform_8, window_bounds = array<i64: 1, 256>}, {transform_indices = @transform_9, window_bounds = array<i64: 8, 128>}]} {
    %c0 = arith.constant 0 : index
    %c0_0 = arith.constant 0 : index
    %0 = vector.load %arg1[%c0, %c0_0] : memref<8x8xf32, #tpu.memory_space<vmem>>, vector<8x8xf32>
    %c0_1 = arith.constant 0 : index
    %c0_2 = arith.constant 0 : index
    %1 = vector.load %arg4[%c0_1, %c0_2] : memref<8x32xf32, #tpu.memory_space<vmem>>, vector<8x32xf32>
    %cst = arith.constant dense<0.000000e+00> : vector<8x32xf32>
    %2 = tpu.matmul %0, %1, %cst {dimension_numbers = #tpu.dot_dimension_numbers<[1], [0], [0], [1], [0, 0, 1, 1], [], []>} : vector<8x8xf32>, vector<8x32xf32>, vector<8x32xf32> -> vector<8x32xf32>
    %c0_3 = arith.constant 0 : index
    %c0_4 = arith.constant 0 : index
    %3 = vector.load %arg5[%c0_3, %c0_4] : memref<1x32xf32, #tpu.memory_space<vmem>>, vector<1x32xf32>
    %4 = vector.broadcast %3 : vector<1x32xf32> to vector<8x32xf32>
    %5 = arith.addf %2, %4 : vector<8x32xf32>
    %cst_5 = arith.constant 0.000000e+00 : f32
    %6 = vector.broadcast %cst_5 : f32 to vector<8x32xf32>
    %7 = arith.maximumf %5, %6 : vector<8x32xf32>
    %c0_6 = arith.constant 0 : index
    %c0_7 = arith.constant 0 : index
    %8 = vector.load %arg6[%c0_6, %c0_7] : memref<32x32xf32, #tpu.memory_space<vmem>>, vector<32x32xf32>
    %cst_8 = arith.constant dense<0.000000e+00> : vector<8x32xf32>
    %9 = tpu.matmul %7, %8, %cst_8 {dimension_numbers = #tpu.dot_dimension_numbers<[1], [0], [0], [1], [0, 0, 1, 1], [], []>} : vector<8x32xf32>, vector<32x32xf32>, vector<8x32xf32> -> vector<8x32xf32>
    %c0_9 = arith.constant 0 : index
    %c0_10 = arith.constant 0 : index
    %10 = vector.load %arg7[%c0_9, %c0_10] : memref<1x32xf32, #tpu.memory_space<vmem>>, vector<1x32xf32>
    %11 = vector.broadcast %10 : vector<1x32xf32> to vector<8x32xf32>
    %12 = arith.addf %9, %11 : vector<8x32xf32>
    %cst_11 = arith.constant 0.000000e+00 : f32
    %13 = vector.broadcast %cst_11 : f32 to vector<8x32xf32>
    %14 = arith.maximumf %12, %13 : vector<8x32xf32>
    %c0_12 = arith.constant 0 : index
    %c0_13 = arith.constant 0 : index
    %15 = vector.load %arg8[%c0_12, %c0_13] : memref<32x256xf32, #tpu.memory_space<vmem>>, vector<32x256xf32>
    %cst_14 = arith.constant dense<0.000000e+00> : vector<8x256xf32>
    %16 = tpu.matmul %14, %15, %cst_14 {dimension_numbers = #tpu.dot_dimension_numbers<[1], [0], [0], [1], [0, 0, 1, 1], [], []>} : vector<8x32xf32>, vector<32x256xf32>, vector<8x256xf32> -> vector<8x256xf32>
    %c0_15 = arith.constant 0 : index
    %c0_16 = arith.constant 0 : index
    %17 = vector.load %arg9[%c0_15, %c0_16] : memref<1x256xf32, #tpu.memory_space<vmem>>, vector<1x256xf32>
    %18 = vector.broadcast %17 : vector<1x256xf32> to vector<8x256xf32>
    %19 = arith.addf %16, %18 : vector<8x256xf32>
    %20 = tpu.iota {dimensions = array<i32: 1>} : vector<8x256xi32>
    %c4_i32 = arith.constant 4 : i32
    %21 = vector.broadcast %c4_i32 : i32 to vector<8x256xi32>
    %22 = arith.cmpi eq, %20, %21 : vector<8x256xi32>
    %23 = math.tanh %19 : vector<8x256xf32>
    %24 = arith.select %22, %19, %23 : vector<8x256xi1>, vector<8x256xf32>
    %25 = vector.extract_strided_slice %24 {offsets = [0, 0], sizes = [8, 128], strides = [1, 1]} : vector<8x256xf32> to vector<8x128xf32>
    %26 = vector.extract_strided_slice %24 {offsets = [0, 128], sizes = [8, 128], strides = [1, 1]} : vector<8x256xf32> to vector<8x128xf32>
    %27 = tpu.iota {dimensions = array<i32: 1>} : vector<8x128xi32>
    %c4_i32_17 = arith.constant 4 : i32
    %28 = vector.broadcast %c4_i32_17 : i32 to vector<8x128xi32>
    %29 = arith.cmpi slt, %27, %28 : vector<8x128xi32>
    %c4_i32_18 = arith.constant 4 : i32
    %30 = vector.broadcast %c4_i32_18 : i32 to vector<8x128xi32>
    %31 = arith.cmpi eq, %27, %30 : vector<8x128xi32>
    %cst_19 = arith.constant 0.000000e+00 : f32
    %32 = vector.broadcast %cst_19 : f32 to vector<8x128xf32>
    %33 = arith.select %31, %25, %32 : vector<8x128xi1>, vector<8x128xf32>
    %cst_20 = arith.constant dense<0.000000e+00> : vector<8xf32>
    %34 = vector.multi_reduction <add>, %33, %cst_20 [1] : vector<8x128xf32> to vector<8xf32>
    %35 = vector.shape_cast %34 : vector<8xf32> to vector<8x1xf32>
    %c0_21 = arith.constant 0 : index
    %c0_22 = arith.constant 0 : index
    %36 = vector.load %arg2[%c0_21, %c0_22] : memref<8x128xf32, #tpu.memory_space<vmem>>, vector<8x128xf32>
    %37 = arith.subf %36, %25 : vector<8x128xf32>
    %cst_23 = arith.constant 2.000000e+00 : f32
    %38 = vector.broadcast %cst_23 : f32 to vector<8x128xf32>
    %39 = arith.mulf %38, %26 : vector<8x128xf32>
    %40 = math.exp %39 : vector<8x128xf32>
    %41 = arith.mulf %40, %37 : vector<8x128xf32>
    %42 = arith.mulf %41, %37 : vector<8x128xf32>
    %cst_24 = arith.constant 0.000000e+00 : f32
    %43 = vector.broadcast %cst_24 : f32 to vector<8x128xf32>
    %44 = arith.select %29, %42, %43 : vector<8x128xi1>, vector<8x128xf32>
    %cst_25 = arith.constant dense<0.000000e+00> : vector<8xf32>
    %45 = vector.multi_reduction <add>, %44, %cst_25 [1] : vector<8x128xf32> to vector<8xf32>
    %46 = vector.shape_cast %45 : vector<8xf32> to vector<8x1xf32>
    %cst_26 = arith.constant -5.000000e-01 : f32
    %47 = vector.broadcast %cst_26 : f32 to vector<8x1xf32>
    %48 = arith.mulf %47, %46 : vector<8x1xf32>
    %49 = arith.addf %48, %35 : vector<8x1xf32>
    %cst_27 = arith.constant 0.000000e+00 : f32
    %50 = vector.broadcast %cst_27 : f32 to vector<8x128xf32>
    %51 = arith.subf %50, %26 : vector<8x128xf32>
    %52 = math.exp %51 : vector<8x128xf32>
    %c0_28 = arith.constant 0 : index
    %c0_29 = arith.constant 0 : index
    %53 = vector.load %arg3[%c0_28, %c0_29] : memref<8x128xf32, #tpu.memory_space<vmem>>, vector<8x128xf32>
    %54 = arith.mulf %52, %53 : vector<8x128xf32>
    %55 = arith.addf %25, %54 : vector<8x128xf32>
    %cst_30 = arith.constant -1.000000e+00 : f32
    %cst_31 = arith.constant 1.000000e+00 : f32
    %56 = vector.broadcast %cst_30 : f32 to vector<8x128xf32>
    %57 = arith.maximumf %56, %55 : vector<8x128xf32>
    %58 = vector.broadcast %cst_31 : f32 to vector<8x128xf32>
    %59 = arith.minimumf %58, %57 : vector<8x128xf32>
    %cst_32 = arith.constant 0.000000e+00 : f32
    %60 = vector.broadcast %cst_32 : f32 to vector<8x128xf32>
    %61 = arith.select %29, %59, %60 : vector<8x128xi1>, vector<8x128xf32>
    %c4_i32_33 = arith.constant 4 : i32
    %62 = vector.broadcast %c4_i32_33 : i32 to vector<8x128xi32>
    %63 = arith.cmpi eq, %27, %62 : vector<8x128xi32>
    %cst_34 = arith.constant 0.000000e+00 : f32
    %64 = vector.shape_cast %49 : vector<8x1xf32> to vector<8x1xf32>
    %65 = vector.broadcast %64 : vector<8x1xf32> to vector<8x128xf32>
    %66 = vector.broadcast %cst_34 : f32 to vector<8x128xf32>
    %67 = arith.select %63, %65, %66 : vector<8x128xi1>, vector<8x128xf32>
    %68 = arith.addf %61, %67 : vector<8x128xf32>
    %c5_i32 = arith.constant 5 : i32
    %69 = vector.broadcast %c5_i32 : i32 to vector<8x128xi32>
    %70 = arith.cmpi eq, %27, %69 : vector<8x128xi32>
    %cst_35 = arith.constant 0.000000e+00 : f32
    %71 = vector.shape_cast %35 : vector<8x1xf32> to vector<8x1xf32>
    %72 = vector.broadcast %71 : vector<8x1xf32> to vector<8x128xf32>
    %73 = vector.broadcast %cst_35 : f32 to vector<8x128xf32>
    %74 = arith.select %70, %72, %73 : vector<8x128xi1>, vector<8x128xf32>
    %75 = arith.addf %68, %74 : vector<8x128xf32>
    %c0_36 = arith.constant 0 : index
    %c0_37 = arith.constant 0 : index
    %76 = vector.load %arg10[%c0_36, %c0_37] : memref<8x128xf32, #tpu.memory_space<vmem>>, vector<8x128xf32>
    tpu.vector_store %arg10[%c0_36, %c0_37], %75 {strides = array<i32>} : memref<8x128xf32, #tpu.memory_space<vmem>>, vector<8x128xf32>,
    return
  }
  func.func @transform_0(%arg0: i32) -> (i32, i32) {
    %c0_i32 = arith.constant 0 : i32
    %c0_i32_0 = arith.constant 0 : i32
    return %arg0, %c0_i32 : i32, i32
  }
  func.func @transform_1(%arg0: i32) -> (i32, i32) {
    %c0_i32 = arith.constant 0 : i32
    %c0_i32_0 = arith.constant 0 : i32
    return %arg0, %c0_i32 : i32, i32
  }
  func.func @transform_2(%arg0: i32) -> (i32, i32) {
    %c0_i32 = arith.constant 0 : i32
    %c0_i32_0 = arith.constant 0 : i32
    return %arg0, %c0_i32 : i32, i32
  }
  func.func @transform_3(%arg0: i32) -> (i32, i32) {
    %c0_i32 = arith.constant 0 : i32
    %c0_i32_0 = arith.constant 0 : i32
    %c0_i32_1 = arith.constant 0 : i32
    return %c0_i32, %c0_i32_0 : i32, i32
  }
  func.func @transform_4(%arg0: i32) -> (i32, i32) {
    %c0_i32 = arith.constant 0 : i32
    %c0_i32_0 = arith.constant 0 : i32
    %c0_i32_1 = arith.constant 0 : i32
    return %c0_i32, %c0_i32_0 : i32, i32
  }
  func.func @transform_5(%arg0: i32) -> (i32, i32) {
    %c0_i32 = arith.constant 0 : i32
    %c0_i32_0 = arith.constant 0 : i32
    %c0_i32_1 = arith.constant 0 : i32
    return %c0_i32, %c0_i32_0 : i32, i32
  }
  func.func @transform_6(%arg0: i32) -> (i32, i32) {
    %c0_i32 = arith.constant 0 : i32
    %c0_i32_0 = arith.constant 0 : i32
    %c0_i32_1 = arith.constant 0 : i32
    return %c0_i32, %c0_i32_0 : i32, i32
  }
  func.func @transform_7(%arg0: i32) -> (i32, i32) {
    %c0_i32 = arith.constant 0 : i32
    %c0_i32_0 = arith.constant 0 : i32
    %c0_i32_1 = arith.constant 0 : i32
    return %c0_i32, %c0_i32_0 : i32, i32
  }
  func.func @transform_8(%arg0: i32) -> (i32, i32) {
    %c0_i32 = arith.constant 0 : i32
    %c0_i32_0 = arith.constant 0 : i32
    %c0_i32_1 = arith.constant 0 : i32
    return %c0_i32, %c0_i32_0 : i32, i32
  }
  func.func @transform_9(%arg0: i32) -> (i32, i32) {
    %c0_i32 = arith.constant 0 : i32
    %c0_i32_0 = arith.constant 0 : i32
    return %arg0, %c0_i32 : i32, i32
  }
}

</mosaic_0001>

<bundles_post_ra>
// kernel: tpu_custom_call.1
= control target key start
LH: loop header
LB: loop body
LE: loop exit
PB: predicated region body
PF: predicated region fallthrough
CT: control target
= control target key end

     0   :  { %14 = vsyncpa [#allocation3], 0  ;;  %s779_s0 = inlined_call_operand.hbm [shape: f32[8,8], index: 0, kind: input, shape index: {}]   ;;  %s780_s1 = inlined_call_operand.hbm [shape: f32[8,128], index: 1, kind: input, shape index: {}]   ;;  %s781_s2 = inlined_call_operand.hbm [shape: f32[8,128], index: 2, kind: input, shape index: {}]   ;;  %s782_s3 = inlined_call_operand.vmem [shape: f32[8,32], index: 3, kind: input, shape index: {}]   ;;  %s783_s4 = inlined_call_operand.vmem [shape: f32[1,32], index: 4, kind: input, shape index: {}]   ;;  %s784_s5 = inlined_call_operand.hbm [shape: f32[32,32], index: 5, kind: input, shape index: {}]   ;;  %s785_s6 = inlined_call_operand.vmem [shape: f32[1,32], index: 6, kind: input, shape index: {}]   ;;  %s786_s7 = inlined_call_operand.hbm [shape: f32[32,256], index: 7, kind: input, shape index: {}]   ;;  %s787_s8 = inlined_call_operand.vmem [shape: f32[1,256], index: 8, kind: input, shape index: {}]   ;;  %s788_s9 = inlined_call_operand.hbm [shape: f32[8,128], index: 9, kind: output, shape index: {}]  }
   0x1   :  { %15 = vsyncpa [#allocation6], 0 }
   0x2   :  { %16 = vsyncpa [#allocation9], 0 }
   0x3   :  { %17 = vsyncpa [#allocation4], 0  ;;  %s620_s30 = smov [#allocation5]   ;;  %s621_s11 = smov [#allocation8]  }
   0x4   :  { %s34_s10 = sshll.u32 %s620_s30, 4  ;;  %s57_s12 = sshll.u32 %s621_s11, 4  ;;  %s35_s10 = int_to_ptr.vmem [resolvable:$true] %s34_s10  ;;  %s683_s12 = int_to_ptr.vmem [resolvable:$true] %s57_s12 }
   0x5   :  { %s480_s15 = scalar_lea.hbm %s780_s1, 128 }
   0x6   :  { %p481_p0 = scmp.ne.s32.totalorder %s780_s1, %s480_s15  ;;  %p484_p1 = scmp.lt.u32.totalorder %s480_s15, %s780_s1 }
   0x8   :  { %p486_p2 = pnand %p484_p1, %p481_p0 }
   0xa   :  { %489 = shalt.err (!%p486_p2)
}
   0xb   :  { %s490_s20 = scalar_lea.vmem %s35_s10, 128  ;;  %p495_p4 = scmp.lt.s32.totalorder %s35_s10, %s35_s10 }
   0xc   :  { %p491_p3 = scmp.ne.s32.totalorder %s35_s10, %s490_s20  ;;  %p496_p5 = scmp.lt.s32.totalorder %s490_s20, %s490_s20 }
   0xe   :  { %p497_p6 = por %p496_p5, %p495_p4 }
  0x10   :  { %p498_p7 = pnand %p497_p6, %p491_p3 }
  0x12   :  { %501 = shalt.err (!%p498_p7)
}
  0x13   :  { %37 = dma.hbm_to_vmem [thread:$0]  %s780_s1, 128, %s35_s10, [#allocation6]  }
  0x14   :  { %s502_s25 = scalar_lea.hbm %s784_s5, 512 }
  0x15   :  { %p503_p8 = scmp.ne.s32.totalorder %s784_s5, %s502_s25  ;;  %p506_p9 = scmp.lt.u32.totalorder %s502_s25, %s784_s5 }
  0x17   :  { %p508_p10 = pnand %p506_p9, %p503_p8 }
  0x19   :  { %511 = shalt.err (!%p508_p10)
}
  0x1a   :  { %s512_s30 = scalar_lea.vmem %s683_s12, 512  ;;  %p517_p12 = scmp.lt.s32.totalorder %s683_s12, %s683_s12 }
  0x1b   :  { %p513_p11 = scmp.ne.s32.totalorder %s683_s12, %s512_s30  ;;  %p518_p13 = scmp.lt.s32.totalorder %s512_s30, %s512_s30 }
  0x1d   :  { %p519_p0 = por %p518_p13, %p517_p12 }
  0x1f   :  { %p520_p1 = pnand %p519_p0, %p513_p11 }
  0x21   :  { %523 = shalt.err (!%p520_p1)
}
  0x22   :  { %s622_s1 = smov 128   ;;  %s623_s10 = smov 8  }
  0x23   :  { %63 = dma.hbm_to_vmem [thread:$0]  %s784_s5, 512, %s683_s12, [#allocation9], %s622_s1, %s622_s1, %s623_s10  }
  0x24   :  { %s624_s14 = smov [#allocation2]   ;;  %s625_s16 = smov [#allocation7]  }
  0x25   :  { %s24_s15 = sshll.u32 %s624_s14, 4  ;;  %s44_s17 = sshll.u32 %s625_s16, 4  ;;  %s25_s15 = int_to_ptr.vmem [resolvable:$true] %s24_s15  ;;  %s45_s17 = int_to_ptr.vmem [resolvable:$true] %s44_s17 }
  0x26   :  { %s524_s20 = scalar_lea.hbm %s779_s0, 128 }
  0x27   :  { %p525_p2 = scmp.ne.s32.totalorder %s779_s0, %s524_s20  ;;  %p528_p3 = scmp.lt.u32.totalorder %s524_s20, %s779_s0 }
  0x29   :  { %p530_p4 = pnand %p528_p3, %p525_p2 }
  0x2b   :  { %533 = shalt.err (!%p530_p4)
}
  0x2c   :  { %s534_s5 = scalar_lea.vmem %s25_s15, 128  ;;  %p539_p6 = scmp.lt.s32.totalorder %s25_s15, %s25_s15 }
  0x2d   :  { %p535_p5 = scmp.ne.s32.totalorder %s25_s15, %s534_s5  ;;  %p540_p7 = scmp.lt.s32.totalorder %s534_s5, %s534_s5 }
  0x2f   :  { %p541_p8 = por %p540_p7, %p539_p6 }
  0x31   :  { %p542_p9 = pnand %p541_p8, %p535_p5 }
  0x33   :  { %545 = shalt.err (!%p542_p9)
}
  0x34   :  { %27 = dma.hbm_to_vmem [thread:$0]  %s779_s0, 128, %s25_s15, [#allocation3]  }
  0x35   :  { %s546_s28 = scalar_lea.hbm %s781_s2, 128 }
  0x36   :  { %p547_p10 = scmp.ne.s32.totalorder %s781_s2, %s546_s28  ;;  %p550_p11 = scmp.lt.u32.totalorder %s546_s28, %s781_s2 }
  0x38   :  { %p552_p12 = pnand %p550_p11, %p547_p10 }
  0x3a   :  { %555 = shalt.err (!%p552_p12)
}
  0x3b   :  { %s556_s11 = scalar_lea.vmem %s45_s17, 128  ;;  %p561_p0 = scmp.lt.s32.totalorder %s45_s17, %s45_s17 }
  0x3c   :  { %p557_p13 = scmp.ne.s32.totalorder %s45_s17, %s556_s11  ;;  %p562_p1 = scmp.lt.s32.totalorder %s556_s11, %s556_s11 }
  0x3e   :  { %p563_p2 = por %p562_p1, %p561_p0 }
  0x40   :  { %p564_p3 = pnand %p563_p2, %p557_p13 }
  0x42   :  { %567 = shalt.err (!%p564_p3)
}
  0x43   :  { %47 = dma.hbm_to_vmem [thread:$0]  %s781_s2, 128, %s45_s17, [#allocation6]  }
  0x44   :  { %s626_s14 = smov [#allocation10]   ;;  %s568_s19 = scalar_lea.hbm %s786_s7, 1024 }
  0x45   :  { %s71_s15 = sshll.u32 %s626_s14, 4  ;;  %p569_p4 = scmp.ne.s32.totalorder %s786_s7, %s568_s19  ;;  %s72_s15 = int_to_ptr.vmem [resolvable:$true] %s71_s15 }
  0x46   :  { %p572_p5 = scmp.lt.u32.totalorder %s568_s19, %s786_s7 }
  0x48   :  { %p574_p6 = pnand %p572_p5, %p569_p4 }
  0x4a   :  { %577 = shalt.err (!%p574_p6)
}
  0x4b   :  { %s578_s24 = scalar_lea.vmem %s72_s15, 1024  ;;  %p583_p8 = scmp.lt.s32.totalorder %s72_s15, %s72_s15 }
  0x4c   :  { %p579_p7 = scmp.ne.s32.totalorder %s72_s15, %s578_s24  ;;  %p584_p9 = scmp.lt.s32.totalorder %s578_s24, %s578_s24 }
  0x4e   :  { %p585_p10 = por %p584_p9, %p583_p8 }
  0x50   :  { %p586_p11 = pnand %p585_p10, %p579_p7 }
  0x52   :  { %589 = shalt.err (!%p586_p11)
}
  0x53   :  { %s627_s2 = smov 256   ;;  %s628_s17 = smov 16  }
  0x54   :  { %77 = dma.hbm_to_vmem [thread:$0]  %s786_s7, 1024, %s72_s15, [#allocation9], %s627_s2, %s627_s2, %s628_s17  }
  0x55   :  { %612 = dma.done.wait [#allocation3], 128  }
  0x56   :  { %613 = vsyncadd [#allocation3], 4294967168 }
  0x57   :  { %614 = dma.done.wait [#allocation6], 256  }
  0x58   :  { %615 = vsyncadd [#allocation6], 4294967040 }
  0x59   :  { %616 = dma.done.wait [#allocation9], 1536  }
  0x5a   :  { %617 = vsyncadd [#allocation9], 4294965760  ;;  %v629_v0 = vmov 0.0   ;;  %vm630_vm0 = vmmov 0   ;;  %v631_v1 = vmov 0.0|0.0   ;;  %vm104_vm1 = vcmask 64512  }
  0x5b   :  { %429 = vmatprep.subr.mxu0 %v629_v0  ;;  %431 = vmatprep.mubr.msk.f32.mxu0 %vm630_vm0, %v629_v0  ;;  %v96_v2 = vld [vmem:[%s782_s3] sm:$0xff]  ;;  %v179_v4 = vld [vmem:[#allocation8] sm:$0xff]  ;;  %v181_v7 = vld [vmem:[#allocation8 + $0x10] sm:$0xff]  ;;  %vm190_vm2 = vcmask 261120   ;;  %v275_v32 = vlaneseq }
  0x5c   :  { %445 = vmatprep.subr.bf16.mxu1 %v631_v1  ;;  %442 = vmatprep.mubr.msk.f32.mxu1 %vm630_vm0, %v629_v0  ;;  %v95_v3 = vld [vmem:[#allocation2] sm:$0xff]  ;;  %v182_v8 = vld [vmem:[#allocation8 + $0x18] sm:$0xff]  ;;  %v265_v12 = vld [vmem:[#allocation10] sm:$0xff] }
  0x5d   :  { %430 = vmatpush3.msra.mxu0 %v96_v2  ;;  %v180_v5 = vld [vmem:[#allocation8 + $0x8] sm:$0xff]  ;;  %v449_v9 = vpack.c.bf16 %v182_v8, %v181_v7  ;;  %v268_v11 = vld [vmem:[#allocation10 + $0x18] sm:$0xff]  ;;  %v267_v14 = vld [vmem:[#allocation10 + $0x10] sm:$0xff]  ;;  %v276_v33 = vshrl.u32 %v275_v32, 7  ;;  %v360_v48 = vand.u32 127, %v275_v32 }
  0x5e   :  { %432 = vmatmul.mubr.msk.f32.vlgmr.msra.gmra.mrb[0].mxu0 %vm104_vm1, %v95_v3  ;;  %v446_v6 = vpack.c.bf16 %v180_v5, %v179_v4  ;;  %v266_v10 = vld [vmem:[#allocation10 + $0x8] sm:$0xff]  ;;  %v453_v15 = vpack.c.bf16 %v267_v14, %v265_v12  ;;  %v272_v22 = vld [vmem:[#allocation10 + $0x38] sm:$0xff]  ;;  %v269_v24 = vld [vmem:[#allocation10 + $0x20] sm:$0xff] }
  0x5f   :  { %352 = vmatprep.mubr.f32.mxu0 %v629_v0  ;;  %v451_v13 = vpack.c.bf16 %v268_v11, %v266_v10  ;;  %v416_v16 = vld [vmem:[%s783_s4] ss:$0 sm:$0xff]  ;;  %v271_v25 = vld [vmem:[#allocation10 + $0x30] sm:$0xff]  ;;  %v281_v34 = vsub.s32 1, %v276_v33  ;;  %v277_v37 = vsub.s32 0, %v276_v33  ;;  %vm362_vm3 = vcmp.eq.s32.totalorder %v360_v48, 4 }
  0x60   :  { %447 = vmatpush3.bf16.msra.mxu1 %v446_v6  ;;  %v270_v21 = vld [vmem:[#allocation10 + $0x28] sm:$0xff]  ;;  %v457_v26 = vpack.c.bf16 %v271_v25, %v269_v24  ;;  %v372_v51 = vld [vmem:[#allocation5] sm:$0xff]  ;;  %v387_v53 = vld [vmem:[#allocation7] sm:$0xff]  ;;  %vm368_vm4 = vcmp.lt.s32.totalorder %v360_v48, 4  ;;  %vm395_vm5 = vcmp.eq.s32.totalorder %v360_v48, 5 }
  0x61   :  { %448 = vmatprep.subr.bf16.mxu1 %v631_v1  ;;  %452 = vmatprep.subr.bf16.mxu0 %v451_v13  ;;  %v455_v23 = vpack.c.bf16 %v272_v22, %v270_v21  ;;  %v418_v27 = vld [vmem:[%s785_s6] ss:$0 sm:$0xff]  ;;  %s632_s6 = smov [#allocation11]  }
  0x62   :  { %454 = vmatpush1.bf16.msra.mxu0 %v453_v15  ;;  %v273_v35 = vld [vmem:[%s787_s8] sm:$0x3]  ;;  %s405_s8 = sshll.u32 %s632_s6, 4  ;;  %s406_s8 = int_to_ptr.vmem [resolvable:$true] %s405_s8 }
  0x63   :  { %456 = vmatprep.subr.bf16.mxu0 %v455_v23  ;;  %v282_v36 = vrot.slane %v273_v35, %v281_v34  ;;  %v278_v41 = vrot.slane %v273_v35, %v277_v37  ;;  %s590_s30 = scalar_lea.vmem %s406_s8, 128  ;;  %p595_p13 = scmp.lt.s32.totalorder %s406_s8, %s406_s8 }
  0x64   :  { %450 = vmatpush3.bf16.msra.mxu1 %v449_v9  ;;  %p591_p12 = scmp.ne.s32.totalorder %s406_s8, %s590_s30  ;;  %p596_p0 = scmp.lt.s32.totalorder %s590_s30, %s590_s30 }
  0x66   :  { %458 = vmatpush1.bf16.msra.mxu0 %v457_v26  ;;  %p597_p1 = por %p596_p0, %p595_p13 }
  0x68   :  { %p598_p2 = pnand %p597_p1, %p591_p12 }
 0x131   :  { %v174_v17 = vpop.f32.mrb[0].mxu0 }
 0x132   :  { %v175_v18 = vadd.f32 %v416_v16, %v174_v17  ;;  %v433_v19 = vpop.f32.mrb[1].mxu0 }
 0x134   :  { %v178_v20 = vmax.f32 %v175_v18, 0.0 }
 0x136   :  { %443 = vmatmul.mubr.msk.f32.vlgmr.msra.gmra.mrb[0].mxu1 %vm190_vm2, %v178_v20 }
 0x209   :  { %v260_v28 = vpop.f32.mrb[0].mxu1 }
 0x20a   :  { %v261_v29 = vadd.f32 %v418_v27, %v260_v28  ;;  %v444_v30 = vpop.f32.mrb[1].mxu1 }
 0x20c   :  { %v264_v31 = vmax.f32 %v261_v29, 0.0 }
 0x20e   :  { %420 = vmatmul.mubr.msk.f32.vlgmr.msra.gmra.mrb[2].mxu0 %vm190_vm2, %v264_v31 }
 0x2e1   :  { %v354_v38 = vpop.f32.mrb[2].mxu0 }
 0x2e2   :  { %v356_v39 = vpop.f32.mrb[3].mxu0  ;;  %v355_v42 = vadd.f32 %v354_v38, %v278_v41 }
 0x2e3   :  { %v357_v40 = vadd.f32 %v356_v39, %v282_v36 }
 0x2e5   :  { %472 = vtanh.f32 %v357_v40 }
 0x2e6   :  { %474 = vtanh.f32 %v355_v42 }
 0x2ef   :  { %v473_v43 = vpop.eup %472 }
 0x2f0   :  { %v374_v44 = vmul.f32 2.0, %v473_v43  ;;  %v384_v45 = vsub.f32 0.0, %v473_v43  ;;  %v475_v49 = vpop.eup %474 }
 0x2f1   :  { %v366_v50 = vsel %vm362_vm3, %v355_v42, %v475_v49 }
 0x2f2   :  { %v375_v46 = vmul.f32 1.442695, %v374_v44  ;;  %v385_v47 = vmul.f32 1.442695, %v384_v45  ;;  %v373_v52 = vsub.f32 %v372_v51, %v366_v50  ;;  %v369_v63 = vsel %vm362_vm3, %v366_v50, 0.0 }
 0x2f4   :  { %476 = vpow2.f32 %v375_v46 }
 0x2f5   :  { %478 = vpow2.f32 %v385_v47 }
 0x2fe   :  { %v477_v54 = vpop.eup %476 }
 0x2ff   :  { %v479_v55 = vpop.eup %478  ;;  %v377_v56 = vmul.f32 %v477_v54, %v373_v52 }
 0x300   :  { %v388_v57 = vmul.f32 %v479_v55, %v387_v53 }
 0x301   :  { %v378_v58 = vmul.f32 %v377_v56, %v373_v52 }
 0x302   :  { %v389_v59 = vadd.f32 %v388_v57, %v366_v50 }
 0x303   :  { %v379_v60 = vsel %vm368_vm4, %v378_v58, 0.0 }
 0x304   :  { %v421_v61 = vclamps-f32 %v389_v59, 1.0  ;;  %380 = vadd.xlane.f32.xlu0 %v379_v60 }
 0x306   :  { %v392_v62 = vsel %vm368_vm4, %v421_v61, 0.0 }
 0x308   :  { %370 = vadd.xlane.f32.xlu0 %v369_v63 }
 0x391   :  { %v381_v0 = vpop.xlane.xlu0 %380 }
 0x392   :  { %v382_v1 = vmul.f32 -0.5, %v381_v0 }
 0x395   :  { %v371_v2 = vpop.xlane.xlu0 %370 }
 0x396   :  { %v383_v3 = vadd.f32 %v382_v1, %v371_v2  ;;  %v396_v6 = vsel %vm395_vm5, %v371_v2, 0.0 }
 0x398   :  { %v393_v4 = vsel %vm362_vm3, %v383_v3, 0.0 }
 0x399   :  { %v394_v5 = vadd.f32 %v393_v4, %v392_v62 }
 0x39b   :  { %v397_v7 = vadd.f32 %v396_v6, %v394_v5 }
 0x39d   :  { %398 = vst [vmem:[#allocation11] sm:$0xff] %v397_v7 }
 0x39e   :  { %601 = shalt.err (!%p598_p2)
}
 0x39f   :  { %s602_s11 = scalar_lea.hbm %s788_s9, 128 }
 0x3a0   :  { %p603_p3 = scmp.ne.s32.totalorder %s788_s9, %s602_s11  ;;  %p606_p4 = scmp.lt.u32.totalorder %s602_s11, %s788_s9 }
 0x3a2   :  { %p608_p5 = pnand %p606_p4, %p603_p3 }
 0x3a4   :  { %611 = shalt.err (!%p608_p5)
}
 0x3a5   :  { %408 = dma.vmem_to_hbm [thread:$0]  %s406_s8, 128, %s788_s9, [#allocation4]  }
 0x3a6   :  { %618 = dma.done.wait [#allocation4], 128  }
 0x3a7   :  { %619 = vsyncadd [#allocation4], 4294967168 }
 0x3a8   :  { %412 = vsyncpa [#allocation3], 1 }
 0x3a9   :  { %413 = vsyncpa [#allocation6], 1 }
 0x3aa   :  { %414 = vsyncpa [#allocation9], 1 }
 0x3ab   :  { %415 = vsyncpa [#allocation4], 1 }

</bundles_post_ra>
